<compile_context>
chip_gen: v5e
topology: v5e:2x2
jax: 0.10.0
libtpu: 0.0.40
codegen_flags: <defaults>
</compile_context>

<pallas_src>
import functools

import jax
import jax.numpy as jnp
from jax.experimental import pallas as pl
from jax.experimental.pallas import tpu as pltpu

LANE = 128
SUBLANE = 8
COLS = 512                       # lane-dense slab width (multiple of 128)
TARGET_BLOCK_BYTES = 1 << 20     # ~1 MiB input block per grid step
NUM_PARALLEL = 2                 # leading "parallel" axis (megacore on v7x)


def _cdiv(a: int, b: int) -> int:
    return -(-a // b)


def _sumsq_kernel(x_ref, o_ref, acc_ref):
    """Accumulate sum(x**2) over the 'arbitrary' axis into a vector scratch."""
    # init vector accumulator at the start of the reduction axis
    @pl.when(pl.program_id(1) == 0)
    def _():
        acc_ref[...] = jnp.zeros_like(acc_ref)

    x = x_ref[...].astype(jnp.float32)   # widen in-register (bf16 stays bf16 in HBM)
    acc_ref[...] += x * x                # pure-VPU inner loop, no per-step XLU reduce

    # one cross-lane reduction + lane-dense store per parallel partition
    @pl.when(pl.program_id(1) == pl.num_programs(1) - 1)
    def _():
        s = jnp.sum(acc_ref[...])
        o_ref[...] = jnp.broadcast_to(s, o_ref.shape)


def _sum_of_squares(p: jax.Array) -> jax.Array:
    """sum(p**2) in f32, via a Pallas TPU reduction over ~1 MiB lane-dense tiles."""
    x = jnp.ravel(p)                     # keep HBM dtype; no wrapper-side upcast
    n = x.shape[0]
    itemsize = jnp.dtype(x.dtype).itemsize

    rows_needed = _cdiv(n, COLS)
    # rows per block: ~TARGET_BLOCK_BYTES of input, sublane-aligned,
    # never larger than the (rounded-up) whole array.
    block_rows = min(TARGET_BLOCK_BYTES // (COLS * itemsize),
                     _cdiv(rows_needed, SUBLANE) * SUBLANE)
    block_rows = max(SUBLANE, (int(block_rows) // SUBLANE) * SUBLANE)

    num_blocks = _cdiv(rows_needed, block_rows)
    # shard across 2 TensorCores (v7x) only when there is enough work
    par = NUM_PARALLEL if num_blocks >= 2 * NUM_PARALLEL else 1
    num_blocks = _cdiv(num_blocks, par) * par
    steps = num_blocks // par

    total = num_blocks * block_rows * COLS
    if total != n:
        x = jnp.pad(x, (0, total - n))   # zero padding does not change sum(x^2)
    mat = x.reshape(num_blocks * block_rows, COLS)

    out = pl.pallas_call(
        _sumsq_kernel,
        out_shape=jax.ShapeDtypeStruct((par, SUBLANE, LANE), jnp.float32),
        grid_spec=pltpu.PrefetchScalarGridSpec(
            num_scalar_prefetch=0,
            grid=(par, steps),
            in_specs=[pl.BlockSpec((block_rows, COLS),
                                   lambda pi, i: (pi * steps + i, 0))],
            # (1, 8, 128) lane-dense output block per parallel partition
            out_specs=pl.BlockSpec((1, SUBLANE, LANE), lambda pi, i: (pi, 0, 0)),
            scratch_shapes=[pltpu.VMEM((block_rows, COLS), jnp.float32)],
        ),
        compiler_params=pltpu.CompilerParams(
            dimension_semantics=("parallel", "arbitrary"),
            vmem_limit_bytes=32 * 1024 * 1024,   # well under v7x's 64 MiB physical
        ),
    )(mat)
    # each partition's scalar is splatted across its (8,128) block; pick one copy
    return jnp.sum(out[:, 0, 0])


def l2_regularization_penalty(params, alpha: float = 0.01) -> jax.Array:
    """alpha * sum_p sum(p**2), one Pallas reduction per parameter tensor."""
    # NOTE: for tiny parameter sets a fused jnp reduction would beat the
    # custom-call overhead; the Pallas path is kept so the kernel exercises
    # the real large-model code path (and is what this script demonstrates).
    partials = [_sum_of_squares(p) for p in params]
    if not partials:
        return jnp.float32(0.0)
    total = functools.reduce(jnp.add, partials)
    return jnp.float32(alpha) * total


class Model:
    """JAX mirror of the AllenNLP `Model` base class (synthetic parameters)."""

    def __init__(self, vocab_size: int = 64, embed_dim: int = 32,
                 hidden_dim: int = 8, regularizer_alpha: float = 0.01,
                 key=None):
        if key is None:
            key = jax.random.PRNGKey(0)
        k_emb, k_w = jax.random.split(key)
        # Deterministic synthetic parameters (shapes a small AllenNLP model
        # would register: token embedding + linear projection + bias).
        self.params = {
            "embedding.weight": jax.random.normal(
                k_emb, (vocab_size, embed_dim), jnp.float32) * 0.02,
            "projection.weight": jax.random.normal(
                k_w, (embed_dim, hidden_dim), jnp.float32) * 0.02,
            "projection.bias": jnp.zeros((hidden_dim,), jnp.float32),
        }
        self._regularizer_alpha = regularizer_alpha
        self.vocab_size = vocab_size

    # ----- mirrored API -----------------------------------------------------
    def named_parameters(self):
        return list(self.params.items())

    def get_parameters_for_histogram_logging(self):
        return [name for name, _ in self.named_parameters()]

    def get_regularization_penalty(self):
        if self._regularizer_alpha is None:
            return None
        return l2_regularization_penalty(
            list(self.params.values()), alpha=self._regularizer_alpha)

    def get_metrics(self, reset: bool = False):
        return {}

    def make_output_human_readable(self, output_dict):
        return output_dict

    def forward(self, *inputs):
        # TODO(synk): base-class forward is abstract (raises NotImplementedError
        # in the reference); there is no concrete forward pass to translate.
        raise NotImplementedError


if __name__ == "__main__":
    key = jax.random.PRNGKey(0)
    model = Model(vocab_size=64, embed_dim=32, hidden_dim=8,
                  regularizer_alpha=0.01, key=key)

    penalty = model.get_regularization_penalty()
    penalty = jax.block_until_ready(penalty)

    # Pure-JAX reference for correctness of the kernel path.
    ref = 0.01 * sum(jnp.sum(p.astype(jnp.float32) ** 2)
                     for p in model.params.values())
    ref = jax.block_until_ready(ref)

    assert jnp.allclose(penalty, ref, rtol=1e-5, atol=1e-6), (penalty, ref)
    print("KERNEL_OK")
</pallas_src>

<mosaic_0001>
module attributes {stable_mosaic.version = 11 : i64} {
  func.func @_sumsq_kernel(%arg0: i32, %arg1: i32, %arg2: memref<8x512xf32, #tpu.memory_space<vmem>>, %arg3: memref<1x8x128xf32, #tpu.memory_space<vmem>>, %arg4: memref<8x512xf32, #tpu.memory_space<vmem>>) attributes {dimension_semantics = [#tpu.dimension_semantics<parallel>, #tpu.dimension_semantics<arbitrary>], iteration_bounds = array<i64: 1, 1>, scalar_prefetch = 0 : i64, scratch_operands = 1 : i64, tpu.core_type = #tpu.core_type<tc>, window_params = [{transform_indices = @transform_0, window_bounds = array<i64: 8, 512>}, {transform_indices = @transform_1, window_bounds = array<i64: 1, 8, 128>}]} {
    %c0_i32 = arith.constant 0 : i32
    %0 = arith.cmpi eq, %arg1, %c0_i32 : i32
    %1 = arith.extui %0 : i1 to i32
    %c0_i32_0 = arith.constant 0 : i32
    %2 = arith.cmpi ne, %1, %c0_i32_0 : i32
    scf.if %2 {
      %cst = arith.constant 0.000000e+00 : f32
      %11 = vector.broadcast %cst : f32 to vector<8x512xf32>
      %c0_8 = arith.constant 0 : index
      %c0_9 = arith.constant 0 : index
      %12 = vector.load %arg4[%c0_8, %c0_9] : memref<8x512xf32, #tpu.memory_space<vmem>>, vector<8x512xf32>
      tpu.vector_store %arg4[%c0_8, %c0_9], %11 {strides = array<i32>} : memref<8x512xf32, #tpu.memory_space<vmem>>, vector<8x512xf32>,
    } else {
    }
    %c0 = arith.constant 0 : index
    %c0_1 = arith.constant 0 : index
    %3 = vector.load %arg2[%c0, %c0_1] : memref<8x512xf32, #tpu.memory_space<vmem>>, vector<8x512xf32>
    %c0_2 = arith.constant 0 : index
    %c0_3 = arith.constant 0 : index
    %4 = vector.load %arg4[%c0_2, %c0_3] : memref<8x512xf32, #tpu.memory_space<vmem>>, vector<8x512xf32>
    %5 = arith.mulf %3, %3 : vector<8x512xf32>
    %6 = arith.addf %4, %5 : vector<8x512xf32>
    %c0_4 = arith.constant 0 : index
    %c0_5 = arith.constant 0 : index
    %7 = vector.load %arg4[%c0_4, %c0_5] : memref<8x512xf32, #tpu.memory_space<vmem>>, vector<8x512xf32>
    tpu.vector_store %arg4[%c0_4, %c0_5], %6 {strides = array<i32>} : memref<8x512xf32, #tpu.memory_space<vmem>>, vector<8x512xf32>,
    %c0_i32_6 = arith.constant 0 : i32
    %8 = arith.cmpi eq, %arg1, %c0_i32_6 : i32
    %9 = arith.extui %8 : i1 to i32
    %c0_i32_7 = arith.constant 0 : i32
    %10 = arith.cmpi ne, %9, %c0_i32_7 : i32
    scf.if %10 {
      %c0_8 = arith.constant 0 : index
      %c0_9 = arith.constant 0 : index
      %11 = vector.load %arg4[%c0_8, %c0_9] : memref<8x512xf32, #tpu.memory_space<vmem>>, vector<8x512xf32>
      %12 = vector.shape_cast %11 : vector<8x512xf32> to vector<1x8x512xf32>
      %cst = arith.constant dense<0.000000e+00> : vector<1xf32>
      %13 = vector.multi_reduction <add>, %12, %cst [1, 2] : vector<1x8x512xf32> to vector<1xf32>
      %14 = vector.shape_cast %13 : vector<1xf32> to vector<1x1x1xf32>
      %15 = vector.extract %14[0, 0, 0] : f32 from vector<1x1x1xf32>
      %16 = vector.broadcast %15 : f32 to vector<1x8x128xf32>
      %c0_10 = arith.constant 0 : index
      %c0_11 = arith.constant 0 : index
      %c0_12 = arith.constant 0 : index
      %17 = vector.load %arg3[%c0_10, %c0_11, %c0_12] : memref<1x8x128xf32, #tpu.memory_space<vmem>>, vector<1x8x128xf32>
      tpu.vector_store %arg3[%c0_10, %c0_11, %c0_12], %16 {strides = array<i32>} : memref<1x8x128xf32, #tpu.memory_space<vmem>>, vector<1x8x128xf32>,
    } else {
    }
    return
  }
  func.func @transform_0(%arg0: i32, %arg1: i32) -> (i32, i32) {
    %c1_i32 = arith.constant 1 : i32
    %0 = arith.muli %arg0, %c1_i32 : i32
    %1 = arith.addi %0, %arg1 : i32
    %c0_i32 = arith.constant 0 : i32
    %c0_i32_0 = arith.constant 0 : i32
    return %1, %c0_i32 : i32, i32
  }
  func.func @transform_1(%arg0: i32, %arg1: i32) -> (i32, i32, i32) {
    %c0_i32 = arith.constant 0 : i32
    %c0_i32_0 = arith.constant 0 : i32
    %c0_i32_1 = arith.constant 0 : i32
    return %arg0, %c0_i32, %c0_i32_0 : i32, i32, i32
  }
}

</mosaic_0001>

<bundles_post_ra>
// kernel: tpu_custom_call.1
= control target key start
LH: loop header
LB: loop body
LE: loop exit
PB: predicated region body
PF: predicated region fallthrough
CT: control target
= control target key end

     0   :  { %6 = vsyncpa [#allocation4], 0  ;;  %s168_s0 = inlined_call_operand.hbm [shape: f32[8,512], index: 0, kind: input, shape index: {}]   ;;  %s169_s1 = inlined_call_operand.hbm [shape: f32[1,8,128], index: 1, kind: output, shape index: {}]  }
   0x1   :  { %7 = vsyncpa [#allocation5], 0  ;;  %s17_s8 = sshll.u32 %s168_s0, 4  ;;  %s150_s9 = smov [#allocation3]   ;;  %s18_s8 = int_to_ptr.hbm [resolvable:$true] %s17_s8 }
   0x2   :  { %s19_s10 = sshll.u32 %s150_s9, 4  ;;  %s20_s10 = int_to_ptr.vmem [resolvable:$true] %s19_s10 }
   0x3   :  { %22 = dma.hbm_to_vmem [thread:$0]  %s18_s8, 512, %s20_s10, [#allocation4]  }
   0x4   :  { %146 = dma.done.wait [#allocation4], 512  }
   0x5   :  { %147 = vsyncadd [#allocation4], 4294966784  ;;  %v36_v0 = vld [vmem:[#allocation3] sm:$0xff]  ;;  %v37_v1 = vld [vmem:[#allocation3 + $0x8] sm:$0xff]  ;;  %s151_s0 = smov [#allocation6]   ;;  %s84_s14 = sshll.u32 %s169_s1, 4  ;;  %s85_s14 = int_to_ptr.hbm [resolvable:$true] %s84_s14 }
   0x6   :  { %v38_v2 = vld [vmem:[#allocation3 + $0x10] sm:$0xff]  ;;  %v39_v3 = vld [vmem:[#allocation3 + $0x18] sm:$0xff]  ;;  %v44_v4 = vmul.f32 %v36_v0, %v36_v0  ;;  %v45_v5 = vmul.f32 %v37_v1, %v37_v1  ;;  %s82_s11 = sshll.u32 %s151_s0, 4  ;;  %s83_s11 = int_to_ptr.vmem [resolvable:$true] %s82_s11 }
   0x7   :  { %v46_v6 = vmul.f32 %v38_v2, %v38_v2  ;;  %v47_v7 = vmul.f32 %v39_v3, %v39_v3 }
   0x8   :  { %v63_v8 = vadd.f32 %v45_v5, %v44_v4 }
   0xa   :  { %v64_v9 = vadd.f32 %v63_v8, %v46_v6 }
   0xc   :  { %v65_v10 = vadd.f32 %v64_v9, %v47_v7 }
   0xe   :  { %66 = vadd.xlane.f32.xlu0 %v65_v10 }
  0x81   :  { %v67_v11 = vpop.xlane.xlu0 %66 }
  0x82   :  { %v68_v12 = vrot.slane %v67_v11, 4 }
  0x84   :  { %v69_v13 = vadd.f32 %v68_v12, %v67_v11 }
  0x86   :  { %v70_v14 = vrot.slane %v69_v13, 2 }
  0x88   :  { %v71_v15 = vadd.f32 %v70_v14, %v69_v13 }
  0x8a   :  { %v72_v16 = vrot.slane %v71_v15, 1 }
  0x8c   :  { %v73_v17 = vadd.f32 %v72_v16, %v71_v15 }
  0x8e   :  { %94 = vpush %v73_v17 }
  0xbf   :  { %s95_s15 = spop %94 }
  0xc0   :  { %v75_v18 = vstv %s95_s15 }
  0xc1   :  { %76 = vst [vmem:[#allocation6] sm:$0xff] %v75_v18 }
  0xc2   :  { %87 = dma.vmem_to_hbm [thread:$0]  %s83_s11, 128, %s85_s14, [#allocation5]  }
  0xc3   :  { %148 = dma.done.wait [#allocation5], 128  }
  0xc4   :  { %149 = vsyncadd [#allocation5], 4294967168 }
  0xc5   :  { %92 = vsyncpa [#allocation4], 1 }
  0xc6   :  { %93 = vsyncpa [#allocation5], 1 }

</bundles_post_ra>
